<compile_context>
chip_gen: v6e
topology: v6e:2x2x1
jax: 0.10.0
libtpu: 0.0.40
codegen_flags: <defaults>
</compile_context>

<pallas_src>
import jax
import jax.numpy as jnp
from jax.experimental import pallas as pl
from jax.experimental.pallas import tpu as pltpu


def _copy_kernel(x_ref, o_ref):
    # One lane-dense full-tile load + unmasked full-tile store.
    o_ref[...] = x_ref[...]


class Lambda:
    """JAX analogue of the PyTorch `Lambda(nn.Module)` wrapper:
    stores a user-defined function `f` and applies it in forward."""

    def __init__(self, f):
        self.f = f  # no parameters -- identical to the nn.Module __init__

    def __call__(self, x):
        return self.f(x)


def flatten(x):
    """Preferred implementation of Lambda(lambda x: x.view(x.size(0), -1)):
    a contiguous row-major flatten is a free metadata reshape (zero HBM
    traffic). Use `pallas_flatten` only when the copy must be fused."""
    return x.reshape(x.shape[0], -1)


def _sublane_multiple(dtype):
    # 8 rows per sublane group for 32-bit, 16 for bf16, 32 for int8.
    itemsize = jnp.dtype(dtype).itemsize
    return 8 * max(1, 4 // itemsize)


def _device_budgets():
    """(tile_budget_bytes, vmem_limit_bytes) per TPU generation.
    Double-buffered in+out ~= 4x tile must stay under the limit."""
    kind = ""
    try:
        kind = jax.devices()[0].device_kind.lower()
    except Exception:
        pass
    if "v7" in kind:                          # 64 MiB VMEM per TC
        return 12 << 20, 56 << 20
    if "v6" in kind:                          # 128 MiB VMEM, 32 MiB scoped default
        return 20 << 20, 100 << 20
    if "v5 lite" in kind or "v5e" in kind or "v5litepod" in kind:
        return 8 << 20, 48 << 20              # 16 MiB scoped default -> raise it
    return 4 << 20, None                      # conservative / unknown hardware


def _lane_dense_reslab(N, feat, itemsize, target_w_bytes=128 << 10):
    """Pick a (rows, W) view of the flat buffer with W a multiple of 128
    (lane-dense, unmasked stores), capped at ~128 KiB per row.
    Falls back to (N, feat) when N*feat is not a multiple of 128."""
    total = N * feat
    if total % 128 != 0:
        return N, feat
    target_w = max(128, ((target_w_bytes // itemsize) // 128) * 128)
    max_k = min(target_w, total) // 128
    for k in range(max_k, 0, -1):
        w = k * 128
        if total % w == 0:
            return total // w, w
    return N, feat


def pallas_flatten(x, *, tile_budget_bytes=None, vmem_limit_bytes=None):
    """f(x) = x.view(x.size(0), -1) as a batch/width-tiled lane-dense Pallas
    copy (for the case where the flatten must live inside a Pallas pipeline)."""
    N = x.shape[0]
    feat = 1
    for d in x.shape[1:]:
        feat *= d
    dtype = jnp.dtype(x.dtype)
    itemsize = dtype.itemsize
    total_bytes = N * feat * itemsize

    dev_budget, dev_limit = _device_budgets()
    if tile_budget_bytes is None:
        tile_budget_bytes = dev_budget
    if vmem_limit_bytes is None:
        vmem_limit_bytes = dev_limit

    # Free contiguous metadata reshape to a lane-dense 2-D slab.
    R, W = _lane_dense_reslab(N, feat, itemsize)
    x2 = x.reshape(R, W)

    mult = _sublane_multiple(dtype)

    # Width tiling guard: if even `mult` rows of the full width blow the
    # budget, tile the width in multiples of 128 (second grid axis).
    if W * itemsize * mult <= tile_budget_bytes or W <= 128:
        block_w = W
    else:
        max_w = max(128, ((tile_budget_bytes // (mult * itemsize)) // 128) * 128)
        block_w = min((W // 128) * 128, max_w)

    row_bytes = block_w * itemsize
    rows_in_budget = max(1, tile_budget_bytes // max(1, row_bytes))
    if rows_in_budget >= R:
        block_r = R
    else:
        block_r = max(mult, (rows_in_budget // mult) * mult)
    block_r = min(block_r, R)

    # Keep >= 2 parallel grid steps on large inputs so both v7x TensorCores
    # issue DMAs (no effect on single-TC v5e/v6e, no effect on tiny inputs).
    if (pl.cdiv(R, block_r) * pl.cdiv(W, block_w)) == 1 \
            and total_bytes > (2 << 20) and R > mult:
        half = pl.cdiv(R, 2)
        block_r = max(mult, ((half + mult - 1) // mult) * mult)

    grid = (pl.cdiv(R, block_r), pl.cdiv(W, block_w))

    compiler_kwargs = dict(dimension_semantics=("parallel", "parallel"))
    if vmem_limit_bytes is not None:
        compiler_kwargs["vmem_limit_bytes"] = int(vmem_limit_bytes)

    out = pl.pallas_call(
        _copy_kernel,
        out_shape=jax.ShapeDtypeStruct((R, W), x.dtype),
        grid=grid,
        in_specs=[pl.BlockSpec((block_r, block_w), lambda i, j: (i, j))],
        out_specs=pl.BlockSpec((block_r, block_w), lambda i, j: (i, j)),
        compiler_params=pltpu.CompilerParams(**compiler_kwargs),
        cost_estimate=pl.CostEstimate(
            flops=0, transcendentals=0,
            bytes_accessed=2 * N * feat * itemsize),
    )(x2)
    return out.reshape(N, feat)


if __name__ == "__main__":
    key = jax.random.PRNGKey(0)

    # Small shapes consistent with InceptionTime's Conv1d "NCL" convention.
    N, C, L = 2, 4, 16
    x = jax.random.normal(key, (N, C, L), dtype=jnp.float32)

    # Lambda stores only `f`; no parameters to init (matches the nn.Module).
    module = Lambda(pallas_flatten)
    out = jax.block_until_ready(module(x))

    ref = x.reshape(N, C * L)  # torch: x.view(x.size(0), -1)
    assert out.shape == (N, C * L), out.shape
    assert jnp.array_equal(out, ref), "Pallas Lambda(flatten) mismatch vs reference"

    # Multi-block pipelined path: tiny forced tile budget -> 128-wide
    # lane-dense blocks over a 12-step grid.
    N2 = 24
    x_big = jax.random.normal(jax.random.PRNGKey(1), (N2, C, L), dtype=jnp.float32)
    out_big = jax.block_until_ready(pallas_flatten(x_big, tile_budget_bytes=1 << 10))
    assert jnp.array_equal(out_big, x_big.reshape(N2, C * L)), "tiled path mismatch"

    # Fallback path: N*feat not a multiple of 128 -> single full-extent block.
    x_odd = jax.random.normal(jax.random.PRNGKey(2), (5, 3, 7), dtype=jnp.float32)
    out_odd = jax.block_until_ready(pallas_flatten(x_odd))
    assert jnp.array_equal(out_odd, x_odd.reshape(5, 21)), "fallback path mismatch"

    # Preferred zero-copy path when the flatten is not fused with compute.
    assert jnp.array_equal(Lambda(flatten)(x), ref), "reshape fast path mismatch"

    print("KERNEL_OK")
</pallas_src>

<mosaic_0001>
module attributes {stable_mosaic.version = 11 : i64} {
  func.func @_copy_kernel(%arg0: i32, %arg1: i32, %arg2: memref<1x128xf32, #tpu.memory_space<vmem>>, %arg3: memref<1x128xf32, #tpu.memory_space<vmem>>) attributes {dimension_semantics = [#tpu.dimension_semantics<parallel>, #tpu.dimension_semantics<parallel>], iteration_bounds = array<i64: 1, 1>, scalar_prefetch = 0 : i64, scratch_operands = 0 : i64, tpu.core_type = #tpu.core_type<tc>, window_params = [{transform_indices = @transform_0, window_bounds = array<i64: 1, 128>}, {transform_indices = @transform_1, window_bounds = array<i64: 1, 128>}]} {
    %c0 = arith.constant 0 : index
    %c0_0 = arith.constant 0 : index
    %0 = vector.load %arg2[%c0, %c0_0] : memref<1x128xf32, #tpu.memory_space<vmem>>, vector<1x128xf32>
    %c0_1 = arith.constant 0 : index
    %c0_2 = arith.constant 0 : index
    %1 = vector.load %arg3[%c0_1, %c0_2] : memref<1x128xf32, #tpu.memory_space<vmem>>, vector<1x128xf32>
    tpu.vector_store %arg3[%c0_1, %c0_2], %0 {strides = array<i32>} : memref<1x128xf32, #tpu.memory_space<vmem>>, vector<1x128xf32>,
    return
  }
  func.func @transform_0(%arg0: i32, %arg1: i32) -> (i32, i32) {
    %c0_i32 = arith.constant 0 : i32
    return %arg0, %arg1 : i32, i32
  }
  func.func @transform_1(%arg0: i32, %arg1: i32) -> (i32, i32) {
    %c0_i32 = arith.constant 0 : i32
    return %arg0, %arg1 : i32, i32
  }
}

</mosaic_0001>

<bundles_post_ra>
// kernel: tpu_custom_call.1
= control target key start
LH: loop header
LB: loop body
LE: loop exit
PB: predicated region body
PF: predicated region fallthrough
CT: control target
= control target key end

     0   :  { %6 = vsyncpa [#allocation3], 0  ;;  %s102_s0 = inlined_call_operand.hbm [shape: f32[1,128], index: 0, kind: input, shape index: {}]   ;;  %s103_s1 = inlined_call_operand.hbm [shape: f32[1,128], index: 1, kind: output, shape index: {}]  }
   0x1   :  { %7 = vsyncpa [#allocation4], 0  ;;  %s84_s6 = smov [#allocation2]  }
   0x2   :  { %s14_s7 = sshll.u32 %s84_s6, 4  ;;  %s15_s7 = int_to_ptr.vmem [resolvable:$true] %s14_s7 }
   0x3   :  { %s48_s8 = scalar_lea.vmem %s15_s7, 16  ;;  %s52_s9 = scalar_lea.vmem %s15_s7, 32 }
   0x4   :  { %p49_p0 = scmp.ne.s32.totalorder %s15_s7, %s48_s8  ;;  %p53_p1 = scmp.lt.s32.totalorder %s15_s7, %s15_s7 }
   0x5   :  { %p54_p2 = scmp.lt.s32.totalorder %s52_s9, %s48_s8 }
   0x7   :  { %p55_p3 = por %p54_p2, %p53_p1 }
   0x9   :  { %p56_p4 = pnand %p55_p3, %p49_p0 }
   0xb   :  { %59 = shalt.err (!%p56_p4)
}
   0xc   :  { %17 = dma.hbm_to_vmem [thread:$0]  %s102_s0, 16, %s15_s7, [#allocation3]  }
   0xd   :  { %80 = dma.done.wait [#allocation3], 16  }
   0xe   :  { %81 = vsyncadd [#allocation3], 4294967280  ;;  %s85_s12 = smov [#allocation5]   ;;  %v21_v0 = vld [vmem:[#allocation2] sm:$0x1] }
   0xf   :  { %s29_s13 = sshll.u32 %s85_s12, 4  ;;  %22 = vst [vmem:[#allocation5] sm:$0x1] %v21_v0  ;;  %s30_s13 = int_to_ptr.vmem [resolvable:$true] %s29_s13 }
  0x10   :  { %s60_s14 = scalar_lea.vmem %s30_s13, 16  ;;  %s64_s15 = scalar_lea.vmem %s30_s13, 32 }
  0x11   :  { %p61_p5 = scmp.ne.s32.totalorder %s30_s13, %s60_s14  ;;  %p65_p6 = scmp.lt.s32.totalorder %s30_s13, %s30_s13 }
  0x12   :  { %p66_p7 = scmp.lt.s32.totalorder %s64_s15, %s60_s14 }
  0x14   :  { %p67_p8 = por %p66_p7, %p65_p6 }
  0x16   :  { %p68_p9 = pnand %p67_p8, %p61_p5 }
  0x18   :  { %71 = shalt.err (!%p68_p9)
}
  0x19   :  { %32 = dma.vmem_to_hbm [thread:$0]  %s30_s13, 16, %s103_s1, [#allocation4]  }
  0x1a   :  { %82 = dma.done.wait [#allocation4], 16  }
  0x1b   :  { %83 = vsyncadd [#allocation4], 4294967280 }
  0x1c   :  { %36 = vsyncpa [#allocation3], 1 }
  0x1d   :  { %37 = vsyncpa [#allocation4], 1 }

</bundles_post_ra>
